<compile_context>
chip_gen: v7x
topology: tpu7x:2x2x1
jax: 0.10.0
libtpu: 0.0.40
codegen_flags: <defaults>
</compile_context>

<pallas_src>
import functools

import numpy as np
import jax
import jax.numpy as jnp
from jax.experimental import pallas as pl
from jax.experimental.pallas import tpu as pltpu

F32_EPS = float(np.finfo(np.float32).eps)
LOG_STD_MIN, LOG_STD_MAX = -20.0, 2.0
HALF_LOG_2PI = 0.5 * float(np.log(2.0 * np.pi))
_LANE = 128


def _round_up(x, m):
    return ((x + m - 1) // m) * m


def _cql_forward_kernel(*refs, act_dim, head_pad, deterministic):
    """Fused CQL actor forward for one batch tile."""
    if deterministic:
        (obs_ref, w1_ref, b1_ref, w2_ref, b2_ref,
         wh_ref, bh_ref, scale_ref, out_ref) = refs
        noise_ref = None
    else:
        (obs_ref, noise_ref, w1_ref, b1_ref, w2_ref, b2_ref,
         wh_ref, bh_ref, scale_ref, out_ref) = refs

    # Trunk: bf16 operands on the MXU, f32 accumulation, f32 bias / activation math.
    x = obs_ref[...].astype(jnp.bfloat16)
    h1 = jnp.dot(x, w1_ref[...], preferred_element_type=jnp.float32) + b1_ref[...]
    h1 = jnp.maximum(h1, 0.0)
    h2 = jnp.dot(h1.astype(jnp.bfloat16), w2_ref[...],
                 preferred_element_type=jnp.float32) + b2_ref[...]
    h2 = jnp.maximum(h2, 0.0)

    # Fused Gaussian heads; log_std block starts on a 128-lane boundary so both
    # slices below are lane-group aligned.
    heads = jnp.dot(h2.astype(jnp.bfloat16), wh_ref[...],
                    preferred_element_type=jnp.float32) + bh_ref[...]
    mu = heads[:, :act_dim]
    log_std = jnp.clip(heads[:, head_pad:head_pad + act_dim],
                       LOG_STD_MIN, LOG_STD_MAX)

    if deterministic:
        # noise == 0: action == mode == mu, the -0.5*z^2 term vanishes.
        action = mu
        lp_elem = -log_std
    else:
        noise = noise_ref[...]
        action = mu + jnp.exp(log_std) * noise
        # z = (action - mu)/std == noise exactly -> no divide needed.
        lp_elem = -0.5 * noise * noise - log_std

    squashed = jnp.tanh(action)
    scale = scale_ref[...]                                   # (1, act_dim)
    corr = jnp.log(scale * (1.0 - squashed * squashed) + F32_EPS)
    # Single fused cross-lane reduce; Gaussian normalization folded into one scalar.
    log_prob = (jnp.sum(lp_elem - corr, axis=-1, keepdims=True)
                - float(act_dim) * HALF_LOG_2PI)

    # One unmasked lane-dense store: [squashed | log_prob (broadcast into padding)].
    rows = squashed.shape[0]
    pad_cols = out_ref.shape[1] - act_dim
    out_ref[...] = jnp.concatenate(
        [squashed, jnp.broadcast_to(log_prob, (rows, pad_cols))], axis=-1)


def pack_cql_actor_params(raw_params, action_high, action_low):
    """One-time packing (hoisted out of the per-call path): fuse mu/log_std heads
    into a single lane-aligned weight, reshape biases, cast matmul weights to bf16."""
    w1, b1, w2, b2, wmu, bmu, wls, bls = (jnp.asarray(p, jnp.float32)
                                          for p in raw_params)
    obs_dim, hidden = w1.shape
    act_dim = wmu.shape[1]
    head_pad = _round_up(act_dim, _LANE)

    w_head = jnp.zeros((hidden, 2 * head_pad), jnp.float32)
    w_head = w_head.at[:, :act_dim].set(wmu)
    w_head = w_head.at[:, head_pad:head_pad + act_dim].set(wls)
    b_head = jnp.zeros((1, 2 * head_pad), jnp.float32)
    b_head = b_head.at[:, :act_dim].set(bmu.reshape(1, act_dim))
    b_head = b_head.at[:, head_pad:head_pad + act_dim].set(bls.reshape(1, act_dim))

    scale = ((jnp.asarray(action_high, jnp.float32)
              - jnp.asarray(action_low, jnp.float32)) / 2.0).reshape(1, act_dim)

    return dict(
        w1=w1.astype(jnp.bfloat16), b1=b1.reshape(1, hidden),
        w2=w2.astype(jnp.bfloat16), b2=b2.reshape(1, hidden),
        w_head=w_head.astype(jnp.bfloat16), b_head=b_head,
        scale=scale,
        obs_dim=obs_dim, hidden=hidden, act_dim=act_dim, head_pad=head_pad)


def cql_policy_forward(obs, packed, noise=None, *, deterministic=False,
                       block_rows=1024):
    """Fused Pallas forward. obs: (B, obs_dim) f32. Returns (squashed_action, log_prob)."""
    obs = jnp.asarray(obs, jnp.float32)
    B, obs_dim = obs.shape
    assert obs_dim == packed["obs_dim"]
    hidden, act_dim, head_pad = packed["hidden"], packed["act_dim"], packed["head_pad"]
    out_pad = _round_up(act_dim + 1, _LANE)

    if not deterministic:
        if noise is None:
            raise ValueError("stochastic forward needs externally sampled noise")
        noise = jnp.asarray(noise, jnp.float32)

    # ---- batch tiling: guarantee >= 2 tiles (v7x megacore) when B > 8 -------------
    if B <= 8:
        TB = _round_up(max(B, 1), 8)
    else:
        TB = min(block_rows, _round_up((B + 1) // 2, 8))

    # ---- VMEM budget: shrink TB rather than exceed a safe scoped cap --------------
    def est_vmem(tb):
        bf16, f32 = 2, 4
        w = (bf16 * int(packed["w1"].size + packed["w2"].size + packed["w_head"].size)
             + f32 * int(packed["b1"].size + packed["b2"].size
                         + packed["b_head"].size + packed["scale"].size))
        io = f32 * tb * (obs_dim + (0 if deterministic else act_dim) + out_pad)
        act = f32 * tb * (2 * hidden + 2 * head_pad + 4 * act_dim)
        return 2 * io + 2 * w + act        # double-buffered IO, 2x weights worst case

    VMEM_CAP = 48 << 20                    # <= 0.75 * v7x per-TC VMEM (64 MiB)
    while est_vmem(TB) > VMEM_CAP and TB > 8:
        TB = max(8, _round_up(TB // 2, 8))

    B_pad = _round_up(B, TB)
    if B_pad != B:
        obs = jnp.pad(obs, ((0, B_pad - B), (0, 0)))
        if not deterministic:
            noise = jnp.pad(noise, ((0, B_pad - B), (0, 0)))
    num_tiles = B_pad // TB

    est = est_vmem(TB)
    cp_kwargs = dict(dimension_semantics=("parallel",))
    if est > (12 << 20):                   # below v5e's 16 MiB scoped default
        cp_kwargs["vmem_limit_bytes"] = int(min(VMEM_CAP, max(est + est // 4, 32 << 20)))

    kernel = functools.partial(_cql_forward_kernel, act_dim=act_dim,
                               head_pad=head_pad, deterministic=deterministic)

    def tile(shape):                       # blocked along the batch axis
        return pl.BlockSpec(shape, lambda i: (i, 0))

    def run(weight_mode):
        if weight_mode is None:
            def resident(shape):
                return pl.BlockSpec(shape, lambda i: (0, 0))
        else:
            def resident(shape):
                return pl.BlockSpec(shape, lambda i: (0, 0), pipeline_mode=weight_mode)

        in_specs = [tile((TB, obs_dim))]
        args = [obs]
        if not deterministic:
            in_specs.append(tile((TB, act_dim)))
            args.append(noise)
        in_specs += [
            resident((obs_dim, hidden)), resident((1, hidden)),
            resident((hidden, hidden)), resident((1, hidden)),
            resident((hidden, 2 * head_pad)), resident((1, 2 * head_pad)),
            resident((1, act_dim)),
        ]
        args += [packed["w1"], packed["b1"], packed["w2"], packed["b2"],
                 packed["w_head"], packed["b_head"], packed["scale"]]

        fn = pl.pallas_call(
            kernel,
            out_shape=jax.ShapeDtypeStruct((B_pad, out_pad), jnp.float32),
            grid=(num_tiles,),
            in_specs=in_specs,
            out_specs=tile((TB, out_pad)),
            compiler_params=pltpu.CompilerParams(**cp_kwargs),
        )
        return fn(*args)

    # Resident weights (constant index_map) don't need double buffering; request a
    # single buffer and fall back gracefully if this jax/libtpu rejects it.
    buffered = getattr(pl, "Buffered", None)
    out = None
    if buffered is not None:
        try:
            out = run(buffered(1))
        except Exception:
            out = None
    if out is None:
        out = run(None)

    squashed = out[:B, :act_dim]
    log_prob = out[:B, act_dim:act_dim + 1]
    return squashed, log_prob


def _reference_forward(obs, raw_params, action_scale, noise, *, bf16_matmul=False):
    """Pure-JAX reference matching CQLPolicy.forward semantics."""
    w1, b1, w2, b2, wmu, bmu, wls, bls = (jnp.asarray(p, jnp.float32)
                                          for p in raw_params)

    def mm(x, w):
        if bf16_matmul:
            return jnp.dot(x.astype(jnp.bfloat16), w.astype(jnp.bfloat16),
                           preferred_element_type=jnp.float32)
        return jnp.dot(x, w, preferred_element_type=jnp.float32)

    h1 = jnp.maximum(mm(obs, w1) + b1.reshape(1, -1), 0.0)
    h2 = jnp.maximum(mm(h1, w2) + b2.reshape(1, -1), 0.0)
    mu = mm(h2, wmu) + bmu.reshape(1, -1)
    log_std = jnp.clip(mm(h2, wls) + bls.reshape(1, -1), LOG_STD_MIN, LOG_STD_MAX)
    std = jnp.exp(log_std)
    action = mu + std * noise
    z = (action - mu) / std
    lp = jnp.sum(-0.5 * z * z - log_std - HALF_LOG_2PI, axis=-1, keepdims=True)
    sq = jnp.tanh(action)
    lp = lp - jnp.sum(
        jnp.log(action_scale.reshape(1, -1) * (1.0 - sq * sq) + F32_EPS),
        axis=-1, keepdims=True)
    return sq, lp


# TODO(synk): learn() (critic losses, CQL logsumexp penalty, optimizer steps, target-net
# sync) is training-loop state + autograd and is not translated; only forward() is fused.

if __name__ == "__main__":
    B, obs_dim, hidden, act_dim = 8, 16, 32, 8

    key = jax.random.PRNGKey(0)
    ks = jax.random.split(key, 8)

    def init_w(k, shape, fan_in):
        return (jax.random.normal(k, shape, jnp.float32)
                / jnp.sqrt(fan_in)).astype(jnp.float32)

    w1 = init_w(ks[0], (obs_dim, hidden), obs_dim)
    b1 = jnp.zeros((hidden,), jnp.float32)
    w2 = init_w(ks[1], (hidden, hidden), hidden)
    b2 = jnp.zeros((hidden,), jnp.float32)
    wmu = init_w(ks[2], (hidden, act_dim), hidden)
    bmu = jnp.zeros((act_dim,), jnp.float32)
    wls = init_w(ks[3], (hidden, act_dim), hidden)
    bls = jnp.zeros((act_dim,), jnp.float32)
    raw_params = (w1, b1, w2, b2, wmu, bmu, wls, bls)

    # action_space: high = +1, low = -1  =>  scale = (high - low) / 2 = 1
    high = np.ones((act_dim,), np.float32)
    low = -np.ones((act_dim,), np.float32)
    action_scale = jnp.asarray((high - low) / 2.0)

    packed = pack_cql_actor_params(raw_params, high, low)   # hoisted: done once

    obs = jax.random.normal(ks[4], (B, obs_dim), jnp.float32)
    noise = jax.random.normal(ks[5], (B, act_dim), jnp.float32)   # rsample eps

    # ---- stochastic (rsample) path ----
    squashed, log_prob = cql_policy_forward(obs, packed, noise)
    squashed, log_prob = jax.block_until_ready((squashed, log_prob))
    assert squashed.shape == (B, act_dim) and log_prob.shape == (B, 1)

    # Tight check vs a reference using the same bf16 matmul operands.
    ref_a, ref_lp = _reference_forward(obs, raw_params, action_scale, noise,
                                       bf16_matmul=True)
    np.testing.assert_allclose(np.asarray(squashed), np.asarray(ref_a),
                               rtol=2e-3, atol=2e-3)
    np.testing.assert_allclose(np.asarray(log_prob), np.asarray(ref_lp),
                               rtol=2e-3, atol=2e-3)

    # Loose check vs the full-f32 reference (difference is bf16 matmul rounding only).
    ref_a32, ref_lp32 = _reference_forward(obs, raw_params, action_scale, noise)
    np.testing.assert_allclose(np.asarray(squashed), np.asarray(ref_a32),
                               rtol=5e-2, atol=5e-2)
    np.testing.assert_allclose(np.asarray(log_prob), np.asarray(ref_lp32),
                               rtol=1e-1, atol=1.5e-1)

    # ---- deterministic (mode) path: no noise DMA, no dead noise FLOPs ----
    det_a, det_lp = cql_policy_forward(obs, packed, deterministic=True)
    det_a, det_lp = jax.block_until_ready((det_a, det_lp))
    zeros = jnp.zeros((B, act_dim), jnp.float32)
    ref_da, ref_dlp = _reference_forward(obs, raw_params, action_scale, zeros,
                                         bf16_matmul=True)
    np.testing.assert_allclose(np.asarray(det_a), np.asarray(ref_da),
                               rtol=2e-3, atol=2e-3)
    np.testing.assert_allclose(np.asarray(det_lp), np.asarray(ref_dlp),
                               rtol=2e-3, atol=2e-3)

    print("KERNEL_OK")
</pallas_src>

<mosaic_0001>
module attributes {stable_mosaic.version = 11 : i64} {
  func.func @_cql_forward_kernel(%arg0: i32, %arg1: memref<8x16xf32, #tpu.memory_space<vmem>>, %arg2: memref<8x8xf32, #tpu.memory_space<vmem>>, %arg3: memref<16x32xbf16, #tpu.memory_space<vmem>>, %arg4: memref<1x32xf32, #tpu.memory_space<vmem>>, %arg5: memref<32x32xbf16, #tpu.memory_space<vmem>>, %arg6: memref<1x32xf32, #tpu.memory_space<vmem>>, %arg7: memref<32x256xbf16, #tpu.memory_space<vmem>>, %arg8: memref<1x256xf32, #tpu.memory_space<vmem>>, %arg9: memref<1x8xf32, #tpu.memory_space<vmem>>, %arg10: memref<8x128xf32, #tpu.memory_space<vmem>>) attributes {dimension_semantics = [#tpu.dimension_semantics<parallel>], iteration_bounds = array<i64: 1>, scalar_prefetch = 0 : i64, scratch_operands = 0 : i64, tpu.core_type = #tpu.core_type<tc>, window_params = [{transform_indices = @transform_0, window_bounds = array<i64: 8, 16>}, {transform_indices = @transform_1, window_bounds = array<i64: 8, 8>}, {pipeline_mode = #tpu.pipeline_mode<synchronous>, transform_indices = @transform_2, window_bounds = array<i64: 16, 32>}, {pipeline_mode = #tpu.pipeline_mode<synchronous>, transform_indices = @transform_3, window_bounds = array<i64: 1, 32>}, {pipeline_mode = #tpu.pipeline_mode<synchronous>, transform_indices = @transform_4, window_bounds = array<i64: 32, 32>}, {pipeline_mode = #tpu.pipeline_mode<synchronous>, transform_indices = @transform_5, window_bounds = array<i64: 1, 32>}, {pipeline_mode = #tpu.pipeline_mode<synchronous>, transform_indices = @transform_6, window_bounds = array<i64: 32, 256>}, {pipeline_mode = #tpu.pipeline_mode<synchronous>, transform_indices = @transform_7, window_bounds = array<i64: 1, 256>}, {pipeline_mode = #tpu.pipeline_mode<synchronous>, transform_indices = @transform_8, window_bounds = array<i64: 1, 8>}, {transform_indices = @transform_9, window_bounds = array<i64: 8, 128>}]} {
    %c0 = arith.constant 0 : index
    %c0_0 = arith.constant 0 : index
    %0 = vector.load %arg1[%c0, %c0_0] : memref<8x16xf32, #tpu.memory_space<vmem>>, vector<8x16xf32>
    %1 = arith.truncf %0 : vector<8x16xf32> to vector<8x16xbf16>
    %c0_1 = arith.constant 0 : index
    %c0_2 = arith.constant 0 : index
    %2 = vector.load %arg3[%c0_1, %c0_2] : memref<16x32xbf16, #tpu.memory_space<vmem>>, vector<16x32xbf16>
    %cst = arith.constant dense<0.000000e+00> : vector<8x32xf32>
    %3 = tpu.matmul %1, %2, %cst {dimension_numbers = #tpu.dot_dimension_numbers<[1], [0], [0], [1], [0, 0, 1, 1], [], []>} : vector<8x16xbf16>, vector<16x32xbf16>, vector<8x32xf32> -> vector<8x32xf32>
    %c0_3 = arith.constant 0 : index
    %c0_4 = arith.constant 0 : index
    %4 = vector.load %arg4[%c0_3, %c0_4] : memref<1x32xf32, #tpu.memory_space<vmem>>, vector<1x32xf32>
    %5 = vector.broadcast %4 : vector<1x32xf32> to vector<8x32xf32>
    %6 = arith.addf %3, %5 : vector<8x32xf32>
    %cst_5 = arith.constant 0.000000e+00 : f32
    %7 = vector.broadcast %cst_5 : f32 to vector<8x32xf32>
    %8 = arith.maximumf %6, %7 : vector<8x32xf32>
    %9 = arith.truncf %8 : vector<8x32xf32> to vector<8x32xbf16>
    %c0_6 = arith.constant 0 : index
    %c0_7 = arith.constant 0 : index
    %10 = vector.load %arg5[%c0_6, %c0_7] : memref<32x32xbf16, #tpu.memory_space<vmem>>, vector<32x32xbf16>
    %cst_8 = arith.constant dense<0.000000e+00> : vector<8x32xf32>
    %11 = tpu.matmul %9, %10, %cst_8 {dimension_numbers = #tpu.dot_dimension_numbers<[1], [0], [0], [1], [0, 0, 1, 1], [], []>} : vector<8x32xbf16>, vector<32x32xbf16>, vector<8x32xf32> -> vector<8x32xf32>
    %c0_9 = arith.constant 0 : index
    %c0_10 = arith.constant 0 : index
    %12 = vector.load %arg6[%c0_9, %c0_10] : memref<1x32xf32, #tpu.memory_space<vmem>>, vector<1x32xf32>
    %13 = vector.broadcast %12 : vector<1x32xf32> to vector<8x32xf32>
    %14 = arith.addf %11, %13 : vector<8x32xf32>
    %cst_11 = arith.constant 0.000000e+00 : f32
    %15 = vector.broadcast %cst_11 : f32 to vector<8x32xf32>
    %16 = arith.maximumf %14, %15 : vector<8x32xf32>
    %17 = arith.truncf %16 : vector<8x32xf32> to vector<8x32xbf16>
    %c0_12 = arith.constant 0 : index
    %c0_13 = arith.constant 0 : index
    %18 = vector.load %arg7[%c0_12, %c0_13] : memref<32x256xbf16, #tpu.memory_space<vmem>>, vector<32x256xbf16>
    %cst_14 = arith.constant dense<0.000000e+00> : vector<8x256xf32>
    %19 = tpu.matmul %17, %18, %cst_14 {dimension_numbers = #tpu.dot_dimension_numbers<[1], [0], [0], [1], [0, 0, 1, 1], [], []>} : vector<8x32xbf16>, vector<32x256xbf16>, vector<8x256xf32> -> vector<8x256xf32>
    %c0_15 = arith.constant 0 : index
    %c0_16 = arith.constant 0 : index
    %20 = vector.load %arg8[%c0_15, %c0_16] : memref<1x256xf32, #tpu.memory_space<vmem>>, vector<1x256xf32>
    %21 = vector.broadcast %20 : vector<1x256xf32> to vector<8x256xf32>
    %22 = arith.addf %19, %21 : vector<8x256xf32>
    %23 = vector.extract_strided_slice %22 {offsets = [0, 0], sizes = [8, 8], strides = [1, 1]} : vector<8x256xf32> to vector<8x8xf32>
    %24 = vector.extract_strided_slice %22 {offsets = [0, 128], sizes = [8, 8], strides = [1, 1]} : vector<8x256xf32> to vector<8x8xf32>
    %cst_17 = arith.constant -2.000000e+01 : f32
    %cst_18 = arith.constant 2.000000e+00 : f32
    %25 = vector.broadcast %cst_17 : f32 to vector<8x8xf32>
    %26 = arith.maximumf %25, %24 : vector<8x8xf32>
    %27 = vector.broadcast %cst_18 : f32 to vector<8x8xf32>
    %28 = arith.minimumf %27, %26 : vector<8x8xf32>
    %c0_19 = arith.constant 0 : index
    %c0_20 = arith.constant 0 : index
    %29 = vector.load %arg2[%c0_19, %c0_20] : memref<8x8xf32, #tpu.memory_space<vmem>>, vector<8x8xf32>
    %30 = math.exp %28 : vector<8x8xf32>
    %31 = arith.mulf %30, %29 : vector<8x8xf32>
    %32 = arith.addf %23, %31 : vector<8x8xf32>
    %cst_21 = arith.constant -5.000000e-01 : f32
    %33 = vector.broadcast %cst_21 : f32 to vector<8x8xf32>
    %34 = arith.mulf %33, %29 : vector<8x8xf32>
    %35 = arith.mulf %34, %29 : vector<8x8xf32>
    %36 = arith.subf %35, %28 : vector<8x8xf32>
    %37 = math.tanh %32 : vector<8x8xf32>
    %c0_22 = arith.constant 0 : index
    %c0_23 = arith.constant 0 : index
    %38 = vector.load %arg9[%c0_22, %c0_23] : memref<1x8xf32, #tpu.memory_space<vmem>>, vector<1x8xf32>
    %39 = arith.mulf %37, %37 : vector<8x8xf32>
    %cst_24 = arith.constant 1.000000e+00 : f32
    %40 = vector.broadcast %cst_24 : f32 to vector<8x8xf32>
    %41 = arith.subf %40, %39 : vector<8x8xf32>
    %42 = vector.broadcast %38 : vector<1x8xf32> to vector<8x8xf32>
    %43 = arith.mulf %42, %41 : vector<8x8xf32>
    %cst_25 = arith.constant 1.1920929E-7 : f32
    %44 = vector.broadcast %cst_25 : f32 to vector<8x8xf32>
    %45 = arith.addf %43, %44 : vector<8x8xf32>
    %46 = math.log %45 : vector<8x8xf32>
    %47 = arith.subf %36, %46 : vector<8x8xf32>
    %cst_26 = arith.constant dense<0.000000e+00> : vector<8xf32>
    %48 = vector.multi_reduction <add>, %47, %cst_26 [1] : vector<8x8xf32> to vector<8xf32>
    %49 = vector.shape_cast %48 : vector<8xf32> to vector<8x1xf32>
    %cst_27 = arith.constant 7.35150814 : f32
    %50 = vector.broadcast %cst_27 : f32 to vector<8x1xf32>
    %51 = arith.subf %49, %50 : vector<8x1xf32>
    %52 = vector.shape_cast %51 : vector<8x1xf32> to vector<8x1xf32>
    %53 = vector.broadcast %52 : vector<8x1xf32> to vector<8x120xf32>
    %54 = tpu.concatenate %37, %53 in 1 : vector<8x8xf32>, vector<8x120xf32> -> vector<8x128xf32>
    %c0_28 = arith.constant 0 : index
    %c0_29 = arith.constant 0 : index
    %55 = vector.load %arg10[%c0_28, %c0_29] : memref<8x128xf32, #tpu.memory_space<vmem>>, vector<8x128xf32>
    tpu.vector_store %arg10[%c0_28, %c0_29], %54 {strides = array<i32>} : memref<8x128xf32, #tpu.memory_space<vmem>>, vector<8x128xf32>,
    return
  }
  func.func @transform_0(%arg0: i32) -> (i32, i32) {
    %c0_i32 = arith.constant 0 : i32
    %c0_i32_0 = arith.constant 0 : i32
    return %arg0, %c0_i32 : i32, i32
  }
  func.func @transform_1(%arg0: i32) -> (i32, i32) {
    %c0_i32 = arith.constant 0 : i32
    %c0_i32_0 = arith.constant 0 : i32
    return %arg0, %c0_i32 : i32, i32
  }
  func.func @transform_2(%arg0: i32) -> (i32, i32) {
    %c0_i32 = arith.constant 0 : i32
    %c0_i32_0 = arith.constant 0 : i32
    %c0_i32_1 = arith.constant 0 : i32
    return %c0_i32, %c0_i32_0 : i32, i32
  }
  func.func @transform_3(%arg0: i32) -> (i32, i32) {
    %c0_i32 = arith.constant 0 : i32
    %c0_i32_0 = arith.constant 0 : i32
    %c0_i32_1 = arith.constant 0 : i32
    return %c0_i32, %c0_i32_0 : i32, i32
  }
  func.func @transform_4(%arg0: i32) -> (i32, i32) {
    %c0_i32 = arith.constant 0 : i32
    %c0_i32_0 = arith.constant 0 : i32
    %c0_i32_1 = arith.constant 0 : i32
    return %c0_i32, %c0_i32_0 : i32, i32
  }
  func.func @transform_5(%arg0: i32) -> (i32, i32) {
    %c0_i32 = arith.constant 0 : i32
    %c0_i32_0 = arith.constant 0 : i32
    %c0_i32_1 = arith.constant 0 : i32
    return %c0_i32, %c0_i32_0 : i32, i32
  }
  func.func @transform_6(%arg0: i32) -> (i32, i32) {
    %c0_i32 = arith.constant 0 : i32
    %c0_i32_0 = arith.constant 0 : i32
    %c0_i32_1 = arith.constant 0 : i32
    return %c0_i32, %c0_i32_0 : i32, i32
  }
  func.func @transform_7(%arg0: i32) -> (i32, i32) {
    %c0_i32 = arith.constant 0 : i32
    %c0_i32_0 = arith.constant 0 : i32
    %c0_i32_1 = arith.constant 0 : i32
    return %c0_i32, %c0_i32_0 : i32, i32
  }
  func.func @transform_8(%arg0: i32) -> (i32, i32) {
    %c0_i32 = arith.constant 0 : i32
    %c0_i32_0 = arith.constant 0 : i32
    %c0_i32_1 = arith.constant 0 : i32
    return %c0_i32, %c0_i32_0 : i32, i32
  }
  func.func @transform_9(%arg0: i32) -> (i32, i32) {
    %c0_i32 = arith.constant 0 : i32
    %c0_i32_0 = arith.constant 0 : i32
    return %arg0, %c0_i32 : i32, i32
  }
}

module attributes {stable_mosaic.version = 11 : i64} {
  func.func @_cql_forward_kernel(%arg0: i32, %arg1: memref<8x16xf32, #tpu.memory_space<vmem>>, %arg2: memref<8x8xf32, #tpu.memory_space<vmem>>, %arg3: memref<16x32xbf16, #tpu.memory_space<vmem>>, %arg4: memref<1x32xf32, #tpu.memory_space<vmem>>, %arg5: memref<32x32xbf16, #tpu.memory_space<vmem>>, %arg6: memref<1x32xf32, #tpu.memory_space<vmem>>, %arg7: memref<32x256xbf16, #tpu.memory_space<vmem>>, %arg8: memref<1x256xf32, #tpu.memory_space<vmem>>, %arg9: memref<1x8xf32, #tpu.memory_space<vmem>>, %arg10: memref<8x128xf32, #tpu.memory_space<vmem>>) attributes {dimension_semantics = [#tpu.dimension_semantics<parallel>], iteration_bounds = array<i64: 1>, scalar_prefetch = 0 : i64, scratch_operands = 0 : i64, tpu.core_type = #tpu.core_type<tc>, window_params = [{transform_indices = @transform_0, window_bounds = array<i64: 8, 16>}, {transform_indices = @transform_1, window_bounds = array<i64: 8, 8>}, {pipeline_mode = #tpu.pipeline_mode<synchronous>, transform_indices = @transform_2, window_bounds = array<i64: 16, 32>}, {pipeline_mode = #tpu.pipeline_mode<synchronous>, transform_indices = @transform_3, window_bounds = array<i64: 1, 32>}, {pipeline_mode = #tpu.pipeline_mode<synchronous>, transform_indices = @transform_4, window_bounds = array<i64: 32, 32>}, {pipeline_mode = #tpu.pipeline_mode<synchronous>, transform_indices = @transform_5, window_bounds = array<i64: 1, 32>}, {pipeline_mode = #tpu.pipeline_mode<synchronous>, transform_indices = @transform_6, window_bounds = array<i64: 32, 256>}, {pipeline_mode = #tpu.pipeline_mode<synchronous>, transform_indices = @transform_7, window_bounds = array<i64: 1, 256>}, {pipeline_mode = #tpu.pipeline_mode<synchronous>, transform_indices = @transform_8, window_bounds = array<i64: 1, 8>}, {transform_indices = @transform_9, window_bounds = array<i64: 8, 128>}]} {
    %c0 = arith.constant 0 : index
    %c0_0 = arith.constant 0 : index
    %0 = vector.load %arg1[%c0, %c0_0] : memref<8x16xf32, #tpu.memory_space<vmem>>, vector<8x16xf32>
    %1 = arith.truncf %0 : vector<8x16xf32> to vector<8x16xbf16>
    %c0_1 = arith.constant 0 : index
    %c0_2 = arith.constant 0 : index
    %2 = vector.load %arg3[%c0_1, %c0_2] : memref<16x32xbf16, #tpu.memory_space<vmem>>, vector<16x32xbf16>
    %cst = arith.constant dense<0.000000e+00> : vector<8x32xf32>
    %3 = tpu.matmul %1, %2, %cst {dimension_numbers = #tpu.dot_dimension_numbers<[1], [0], [0], [1], [0, 0, 1, 1], [], []>} : vector<8x16xbf16>, vector<16x32xbf16>, vector<8x32xf32> -> vector<8x32xf32>
    %c0_3 = arith.constant 0 : index
    %c0_4 = arith.constant 0 : index
    %4 = vector.load %arg4[%c0_3, %c0_4] : memref<1x32xf32, #tpu.memory_space<vmem>>, vector<1x32xf32>
    %5 = vector.broadcast %4 : vector<1x32xf32> to vector<8x32xf32>
    %6 = arith.addf %3, %5 : vector<8x32xf32>
    %cst_5 = arith.constant 0.000000e+00 : f32
    %7 = vector.broadcast %cst_5 : f32 to vector<8x32xf32>
    %8 = arith.maximumf %6, %7 : vector<8x32xf32>
    %9 = arith.truncf %8 : vector<8x32xf32> to vector<8x32xbf16>
    %c0_6 = arith.constant 0 : index
    %c0_7 = arith.constant 0 : index
    %10 = vector.load %arg5[%c0_6, %c0_7] : memref<32x32xbf16, #tpu.memory_space<vmem>>, vector<32x32xbf16>
    %cst_8 = arith.constant dense<0.000000e+00> : vector<8x32xf32>
    %11 = tpu.matmul %9, %10, %cst_8 {dimension_numbers = #tpu.dot_dimension_numbers<[1], [0], [0], [1], [0, 0, 1, 1], [], []>} : vector<8x32xbf16>, vector<32x32xbf16>, vector<8x32xf32> -> vector<8x32xf32>
    %c0_9 = arith.constant 0 : index
    %c0_10 = arith.constant 0 : index
    %12 = vector.load %arg6[%c0_9, %c0_10] : memref<1x32xf32, #tpu.memory_space<vmem>>, vector<1x32xf32>
    %13 = vector.broadcast %12 : vector<1x32xf32> to vector<8x32xf32>
    %14 = arith.addf %11, %13 : vector<8x32xf32>
    %cst_11 = arith.constant 0.000000e+00 : f32
    %15 = vector.broadcast %cst_11 : f32 to vector<8x32xf32>
    %16 = arith.maximumf %14, %15 : vector<8x32xf32>
    %17 = arith.truncf %16 : vector<8x32xf32> to vector<8x32xbf16>
    %c0_12 = arith.constant 0 : index
    %c0_13 = arith.constant 0 : index
    %18 = vector.load %arg7[%c0_12, %c0_13] : memref<32x256xbf16, #tpu.memory_space<vmem>>, vector<32x256xbf16>
    %cst_14 = arith.constant dense<0.000000e+00> : vector<8x256xf32>
    %19 = tpu.matmul %17, %18, %cst_14 {dimension_numbers = #tpu.dot_dimension_numbers<[1], [0], [0], [1], [0, 0, 1, 1], [], []>} : vector<8x32xbf16>, vector<32x256xbf16>, vector<8x256xf32> -> vector<8x256xf32>
    %c0_15 = arith.constant 0 : index
    %c0_16 = arith.constant 0 : index
    %20 = vector.load %arg8[%c0_15, %c0_16] : memref<1x256xf32, #tpu.memory_space<vmem>>, vector<1x256xf32>
    %21 = vector.broadcast %20 : vector<1x256xf32> to vector<8x256xf32>
    %22 = arith.addf %19, %21 : vector<8x256xf32>
    %23 = vector.extract_strided_slice %22 {offsets = [0, 0], sizes = [8, 8], strides = [1, 1]} : vector<8x256xf32> to vector<8x8xf32>
    %24 = vector.extract_strided_slice %22 {offsets = [0, 128], sizes = [8, 8], strides = [1, 1]} : vector<8x256xf32> to vector<8x8xf32>
    %cst_17 = arith.constant -2.000000e+01 : f32
    %cst_18 = arith.constant 2.000000e+00 : f32
    %25 = vector.broadcast %cst_17 : f32 to vector<8x8xf32>
    %26 = arith.maximumf %25, %24 : vector<8x8xf32>
    %27 = vector.broadcast %cst_18 : f32 to vector<8x8xf32>
    %28 = arith.minimumf %27, %26 : vector<8x8xf32>
    %c0_19 = arith.constant 0 : index
    %c0_20 = arith.constant 0 : index
    %29 = vector.load %arg2[%c0_19, %c0_20] : memref<8x8xf32, #tpu.memory_space<vmem>>, vector<8x8xf32>
    %30 = math.exp %28 : vector<8x8xf32>
    %31 = arith.mulf %30, %29 : vector<8x8xf32>
    %32 = arith.addf %23, %31 : vector<8x8xf32>
    %cst_21 = arith.constant -5.000000e-01 : f32
    %33 = vector.broadcast %cst_21 : f32 to vector<8x8xf32>
    %34 = arith.mulf %33, %29 : vector<8x8xf32>
    %35 = arith.mulf %34, %29 : vector<8x8xf32>
    %36 = arith.subf %35, %28 : vector<8x8xf32>
    %37 = math.tanh %32 : vector<8x8xf32>
    %c0_22 = arith.constant 0 : index
    %c0_23 = arith.constant 0 : index
    %38 = vector.load %arg9[%c0_22, %c0_23] : memref<1x8xf32, #tpu.memory_space<vmem>>, vector<1x8xf32>
    %39 = arith.mulf %37, %37 : vector<8x8xf32>
    %cst_24 = arith.constant 1.000000e+00 : f32
    %40 = vector.broadcast %cst_24 : f32 to vector<8x8xf32>
    %41 = arith.subf %40, %39 : vector<8x8xf32>
    %42 = vector.broadcast %38 : vector<1x8xf32> to vector<8x8xf32>
    %43 = arith.mulf %42, %41 : vector<8x8xf32>
    %cst_25 = arith.constant 1.1920929E-7 : f32
    %44 = vector.broadcast %cst_25 : f32 to vector<8x8xf32>
    %45 = arith.addf %43, %44 : vector<8x8xf32>
    %46 = math.log %45 : vector<8x8xf32>
    %47 = arith.subf %36, %46 : vector<8x8xf32>
    %cst_26 = arith.constant dense<0.000000e+00> : vector<8xf32>
    %48 = vector.multi_reduction <add>, %47, %cst_26 [1] : vector<8x8xf32> to vector<8xf32>
    %49 = vector.shape_cast %48 : vector<8xf32> to vector<8x1xf32>
    %cst_27 = arith.constant 7.35150814 : f32
    %50 = vector.broadcast %cst_27 : f32 to vector<8x1xf32>
    %51 = arith.subf %49, %50 : vector<8x1xf32>
    %52 = vector.shape_cast %51 : vector<8x1xf32> to vector<8x1xf32>
    %53 = vector.broadcast %52 : vector<8x1xf32> to vector<8x120xf32>
    %54 = tpu.concatenate %37, %53 in 1 : vector<8x8xf32>, vector<8x120xf32> -> vector<8x128xf32>
    %c0_28 = arith.constant 0 : index
    %c0_29 = arith.constant 0 : index
    %55 = vector.load %arg10[%c0_28, %c0_29] : memref<8x128xf32, #tpu.memory_space<vmem>>, vector<8x128xf32>
    tpu.vector_store %arg10[%c0_28, %c0_29], %54 {strides = array<i32>} : memref<8x128xf32, #tpu.memory_space<vmem>>, vector<8x128xf32>,
    return
  }
  func.func @transform_0(%arg0: i32) -> (i32, i32) {
    %c0_i32 = arith.constant 0 : i32
    %c0_i32_0 = arith.constant 0 : i32
    return %arg0, %c0_i32 : i32, i32
  }
  func.func @transform_1(%arg0: i32) -> (i32, i32) {
    %c0_i32 = arith.constant 0 : i32
    %c0_i32_0 = arith.constant 0 : i32
    return %arg0, %c0_i32 : i32, i32
  }
  func.func @transform_2(%arg0: i32) -> (i32, i32) {
    %c0_i32 = arith.constant 0 : i32
    %c0_i32_0 = arith.constant 0 : i32
    %c0_i32_1 = arith.constant 0 : i32
    return %c0_i32, %c0_i32_0 : i32, i32
  }
  func.func @transform_3(%arg0: i32) -> (i32, i32) {
    %c0_i32 = arith.constant 0 : i32
    %c0_i32_0 = arith.constant 0 : i32
    %c0_i32_1 = arith.constant 0 : i32
    return %c0_i32, %c0_i32_0 : i32, i32
  }
  func.func @transform_4(%arg0: i32) -> (i32, i32) {
    %c0_i32 = arith.constant 0 : i32
    %c0_i32_0 = arith.constant 0 : i32
    %c0_i32_1 = arith.constant 0 : i32
    return %c0_i32, %c0_i32_0 : i32, i32
  }
  func.func @transform_5(%arg0: i32) -> (i32, i32) {
    %c0_i32 = arith.constant 0 : i32
    %c0_i32_0 = arith.constant 0 : i32
    %c0_i32_1 = arith.constant 0 : i32
    return %c0_i32, %c0_i32_0 : i32, i32
  }
  func.func @transform_6(%arg0: i32) -> (i32, i32) {
    %c0_i32 = arith.constant 0 : i32
    %c0_i32_0 = arith.constant 0 : i32
    %c0_i32_1 = arith.constant 0 : i32
    return %c0_i32, %c0_i32_0 : i32, i32
  }
  func.func @transform_7(%arg0: i32) -> (i32, i32) {
    %c0_i32 = arith.constant 0 : i32
    %c0_i32_0 = arith.constant 0 : i32
    %c0_i32_1 = arith.constant 0 : i32
    return %c0_i32, %c0_i32_0 : i32, i32
  }
  func.func @transform_8(%arg0: i32) -> (i32, i32) {
    %c0_i32 = arith.constant 0 : i32
    %c0_i32_0 = arith.constant 0 : i32
    %c0_i32_1 = arith.constant 0 : i32
    return %c0_i32, %c0_i32_0 : i32, i32
  }
  func.func @transform_9(%arg0: i32) -> (i32, i32) {
    %c0_i32 = arith.constant 0 : i32
    %c0_i32_0 = arith.constant 0 : i32
    return %arg0, %c0_i32 : i32, i32
  }
}

</mosaic_0001>

<bundles_post_ra>
// kernel: tpu_custom_call.1
= control target key start
LH: loop header
LB: loop body
LE: loop exit
PB: predicated region body
PF: predicated region fallthrough
CT: control target
= control target key end

     0   :  { %14 = vsyncpa [#allocation3], 0  ;;  %s715_s0 = inlined_call_operand.hbm [shape: f32[8,16], index: 0, kind: input, shape index: {}]   ;;  %s716_s1 = inlined_call_operand.hbm [shape: f32[8,8], index: 1, kind: input, shape index: {}]   ;;  %s717_s2 = inlined_call_operand.hbm [shape: bf16[16,32], index: 2, kind: input, shape index: {}]   ;;  %s718_s3 = inlined_call_operand.vmem [shape: f32[1,32], index: 3, kind: input, shape index: {}]   ;;  %s719_s4 = inlined_call_operand.hbm [shape: bf16[32,32], index: 4, kind: input, shape index: {}]   ;;  %s720_s5 = inlined_call_operand.vmem [shape: f32[1,32], index: 5, kind: input, shape index: {}]   ;;  %s721_s6 = inlined_call_operand.hbm [shape: bf16[32,256], index: 6, kind: input, shape index: {}]   ;;  %s722_s7 = inlined_call_operand.vmem [shape: f32[1,256], index: 7, kind: input, shape index: {}]   ;;  %s723_s8 = inlined_call_operand.vmem [shape: f32[1,8], index: 8, kind: input, shape index: {}]   ;;  %s724_s9 = inlined_call_operand.hbm [shape: f32[8,128], index: 9, kind: output, shape index: {}]  }
   0x1   :  { %15 = vsyncpa [#allocation6], 0 }
   0x2   :  { %16 = vsyncpa [#allocation9], 0 }
   0x3   :  { %17 = vsyncpa [#allocation4], 0  ;;  %s560_s30 = smov [#allocation5]   ;;  %s420_s13 = scalar_lea.hbm %s716_s1, 128 }
   0x4   :  { %s34_s10 = sshll.u32 %s560_s30, 4  ;;  %p421_p0 = scmp.ne.s32.totalorder %s716_s1, %s420_s13  ;;  %s35_s10 = int_to_ptr.vmem [resolvable:$true] %s34_s10 }
   0x5   :  { %p424_p1 = scmp.lt.u32.totalorder %s420_s13, %s716_s1 }
   0x7   :  { %p426_p2 = pnand %p424_p1, %p421_p0 }
   0x9   :  { %429 = shalt.err (!%p426_p2)
}
   0xa   :  { %s430_s18 = scalar_lea.vmem %s35_s10, 128  ;;  %p435_p4 = scmp.lt.s32.totalorder %s35_s10, %s35_s10 }
   0xb   :  { %p431_p3 = scmp.ne.s32.totalorder %s35_s10, %s430_s18  ;;  %p436_p5 = scmp.lt.s32.totalorder %s430_s18, %s430_s18 }
   0xd   :  { %p437_p6 = por %p436_p5, %p435_p4 }
   0xf   :  { %p438_p7 = pnand %p437_p6, %p431_p3 }
  0x11   :  { %441 = shalt.err (!%p438_p7)
}
  0x12   :  { %37 = dma.hbm_to_vmem [thread:$0]  %s716_s1, 128, %s35_s10, [#allocation6]  }
  0x13   :  { %s561_s21 = smov [#allocation8]   ;;  %s562_s23 = smov [#allocation2]  }
  0x14   :  { %s57_s22 = sshll.u32 %s561_s21, 4  ;;  %s24_s24 = sshll.u32 %s562_s23, 4  ;;  %s58_s22 = int_to_ptr.vmem [resolvable:$true] %s57_s22  ;;  %s25_s24 = int_to_ptr.vmem [resolvable:$true] %s24_s24 }
  0x15   :  { %s442_s27 = scalar_lea.hbm %s719_s4, 256 }
  0x16   :  { %p443_p8 = scmp.ne.s32.totalorder %s719_s4, %s442_s27  ;;  %p446_p9 = scmp.lt.u32.totalorder %s442_s27, %s719_s4 }
  0x18   :  { %p448_p10 = pnand %p446_p9, %p443_p8 }
  0x1a   :  { %451 = shalt.err (!%p448_p10)
}
  0x1b   :  { %s452_s1 = scalar_lea.vmem %s58_s22, 256  ;;  %p457_p12 = scmp.lt.s32.totalorder %s58_s22, %s58_s22 }
  0x1c   :  { %p453_p11 = scmp.ne.s32.totalorder %s58_s22, %s452_s1  ;;  %p458_p13 = scmp.lt.s32.totalorder %s452_s1, %s452_s1 }
  0x1e   :  { %p459_p0 = por %p458_p13, %p457_p12 }
  0x20   :  { %p460_p1 = pnand %p459_p0, %p453_p11 }
  0x22   :  { %463 = shalt.err (!%p460_p1)
}
  0x23   :  { %s563_s10 = smov 64   ;;  %s564_s12 = smov 4  }
  0x24   :  { %63 = dma.hbm_to_vmem [thread:$0]  %s719_s4, 256, %s58_s22, [#allocation9], %s563_s10, %s563_s10, %s564_s12  }
  0x25   :  { %s464_s17 = scalar_lea.hbm %s715_s0, 128 }
  0x26   :  { %p465_p2 = scmp.ne.s32.totalorder %s715_s0, %s464_s17  ;;  %p468_p3 = scmp.lt.u32.totalorder %s464_s17, %s715_s0 }
  0x28   :  { %p470_p4 = pnand %p468_p3, %p465_p2 }
  0x2a   :  { %473 = shalt.err (!%p470_p4)
}
  0x2b   :  { %s474_s23 = scalar_lea.vmem %s25_s24, 128  ;;  %p479_p6 = scmp.lt.s32.totalorder %s25_s24, %s25_s24 }
  0x2c   :  { %p475_p5 = scmp.ne.s32.totalorder %s25_s24, %s474_s23  ;;  %p480_p7 = scmp.lt.s32.totalorder %s474_s23, %s474_s23 }
  0x2e   :  { %p481_p8 = por %p480_p7, %p479_p6 }
  0x30   :  { %p482_p9 = pnand %p481_p8, %p475_p5 }
  0x32   :  { %485 = shalt.err (!%p482_p9)
}
  0x33   :  { %27 = dma.hbm_to_vmem [thread:$0]  %s715_s0, 128, %s25_s24, [#allocation3]  }
  0x34   :  { %s565_s25 = smov [#allocation7]   ;;  %s566_s27 = smov [#allocation10]  }
  0x35   :  { %s43_s26 = sshll.u32 %s565_s25, 4  ;;  %s71_s28 = sshll.u32 %s566_s27, 4  ;;  %s44_s26 = int_to_ptr.vmem [resolvable:$true] %s43_s26  ;;  %s72_s28 = int_to_ptr.vmem [resolvable:$true] %s71_s28 }
  0x36   :  { %s486_s11 = scalar_lea.hbm %s717_s2, 128 }
  0x37   :  { %p487_p10 = scmp.ne.s32.totalorder %s717_s2, %s486_s11  ;;  %p490_p11 = scmp.lt.u32.totalorder %s486_s11, %s717_s2 }
  0x39   :  { %p492_p12 = pnand %p490_p11, %p487_p10 }
  0x3b   :  { %495 = shalt.err (!%p492_p12)
}
  0x3c   :  { %s496_s0 = scalar_lea.vmem %s44_s26, 128  ;;  %p501_p0 = scmp.lt.s32.totalorder %s44_s26, %s44_s26 }
  0x3d   :  { %p497_p13 = scmp.ne.s32.totalorder %s44_s26, %s496_s0  ;;  %p502_p1 = scmp.lt.s32.totalorder %s496_s0, %s496_s0 }
  0x3f   :  { %p503_p2 = por %p502_p1, %p501_p0 }
  0x41   :  { %p504_p3 = pnand %p503_p2, %p497_p13 }
  0x43   :  { %507 = shalt.err (!%p504_p3)
}
  0x44   :  { %49 = dma.hbm_to_vmem [thread:$0]  %s717_s2, 128, %s44_s26, [#allocation6], %s563_s10, %s563_s10, %s564_s12  }
  0x45   :  { %s508_s19 = scalar_lea.hbm %s721_s6, 512 }
  0x46   :  { %p509_p4 = scmp.ne.s32.totalorder %s721_s6, %s508_s19  ;;  %p512_p5 = scmp.lt.u32.totalorder %s508_s19, %s721_s6 }
  0x48   :  { %p514_p6 = pnand %p512_p5, %p509_p4 }
  0x4a   :  { %517 = shalt.err (!%p514_p6)
}
  0x4b   :  { %s518_s22 = scalar_lea.vmem %s72_s28, 512  ;;  %p523_p8 = scmp.lt.s32.totalorder %s72_s28, %s72_s28 }
  0x4c   :  { %p519_p7 = scmp.ne.s32.totalorder %s72_s28, %s518_s22  ;;  %p524_p9 = scmp.lt.s32.totalorder %s518_s22, %s518_s22 }
  0x4e   :  { %p525_p10 = por %p524_p9, %p523_p8 }
  0x50   :  { %p526_p11 = pnand %p525_p10, %p519_p7 }
  0x52   :  { %529 = shalt.err (!%p526_p11)
}
  0x53   :  { %s567_s2 = smov 128   ;;  %s568_s10 = smov 8  }
  0x54   :  { %77 = dma.hbm_to_vmem [thread:$0]  %s721_s6, 512, %s72_s28, [#allocation9], %s567_s2, %s567_s2, %s568_s10  }
  0x55   :  { %552 = dma.done.wait [#allocation3], 128  }
  0x56   :  { %553 = vsyncadd [#allocation3], 4294967168 }
  0x57   :  { %554 = dma.done.wait [#allocation6], 256  }
  0x58   :  { %555 = vsyncadd [#allocation6], 4294967040 }
  0x59   :  { %556 = dma.done.wait [#allocation9], 768  }
  0x5a   :  { %557 = vsyncadd [#allocation9], 4294966528  ;;  %v569_v0 = vmov 0.0   ;;  %vm570_vm0 = vmmov 0   ;;  %v405_v1 = vld [vmem:[#allocation7] sm:$0xff]   ;;  %v98_v2 = vld [vmem:[#allocation2] sm:$0xff]  ;;  %v236_v27 = vlaneseq }
  0x5b   :  { %378 = vmatprep.subr.bf16.mxu0 %v569_v0  ;;  %380 = vmatprep.mubr.msk.bf16.mxu0 %vm570_vm0, %v569_v0  ;;  %vm115_vm1 = vcmask 130048   ;;  %v99_v3 = vpack.c.bf16 %v98_v2, %v98_v2  ;;  %v406_v4 = vld [vmem:[#allocation8] sm:$0xff]   ;;  %v407_v5 = vld [vmem:[#allocation8 + $0x8] sm:$0xff]   ;;  %v408_v6 = vld [vmem:[#allocation10] ss:$8 sps:$4 sm:$0xff]   ;;  %vm184_vm2 = vcmask 261120  }
  0x5c   :  { %384 = vmatprep.subr.bf16.mxu1 %v569_v0  ;;  %388 = vmatprep.mubr.msk.bf16.mxu1 %vm570_vm0, %v569_v0  ;;  %v410_v7 = vld [vmem:[#allocation10 + $0x4] ss:$8 sps:$4 sm:$0xff]   ;;  %v359_v8 = vld [vmem:[%s718_s3] ss:$0 sm:$0xff]  ;;  %v413_v16 = vld [vmem:[#allocation10 + $0x14] ss:$8 sps:$4 sm:$0xff]  }
  0x5d   :  { %379 = vmatpush3.bf16.msra.mxu0 %v405_v1  ;;  %385 = vmatpush3.bf16.msra.mxu1 %v406_v4  ;;  %v411_v17 = vld [vmem:[#allocation10 + $0x10] ss:$8 sps:$4 sm:$0xff]   ;;  %v571_v18 = vmov 0   ;;  %v237_v28 = vshrl.u32 %v236_v27, 7  ;;  %v312_v43 = vld [vmem:[#allocation5] sm:$0xff]  ;;  %vm335_vm3 = vcmask 64512  }
  0x5e   :  { %386 = vmatprep.subr.bf16.mxu1 %v569_v0  ;;  %269 = vmatprep.subr.bf16.mxu0 %v410_v7  ;;  %v362_v19 = vld [vmem:[%s720_s5] ss:$0 sm:$0xff]  ;;  %v317_v53 = vmul.f32 -0.5, %v312_v43  ;;  %s572_s30 = smov [#allocation11]  }
  0x5f   :  { %v242_v29 = vsub.s32 1, %v237_v28  ;;  %v234_v30 = vld [vmem:[%s722_s7] sm:$0x3]  ;;  %v238_v40 = vsub.s32 0, %v237_v28  ;;  %s348_s11 = sshll.u32 %s572_s30, 4  ;;  %s349_s11 = int_to_ptr.vmem [resolvable:$true] %s348_s11 }
  0x60   :  { %381 = vmatmul.mubr.msk.bf16.vlgmr.msra.gmra.mrb[0].mxu0 %vm115_vm1, %v99_v3  ;;  %v371_v49 = vld [vmem:[%s723_s8] ss:$0 sm:$0xff]  ;;  %v318_v54 = vmul.f32 %v317_v53, %v312_v43  ;;  %s530_s8 = scalar_lea.vmem %s349_s11, 128  ;;  %p535_p13 = scmp.lt.s32.totalorder %s349_s11, %s349_s11 }
  0x61   :  { %387 = vmatpush3.bf16.msra.mxu1 %v407_v5  ;;  %270 = vmatpush1.bf16.msra.mxu0 %v408_v6  ;;  %v243_v31 = vrot.slane %v234_v30, %v242_v29  ;;  %v239_v41 = vrot.slane %v234_v30, %v238_v40  ;;  %p531_p12 = scmp.ne.s32.totalorder %s349_s11, %s530_s8  ;;  %p536_p0 = scmp.lt.s32.totalorder %s530_s8, %s530_s8 }
  0x62   :  { %271 = vmatprep.subr.bf16.mxu0 %v413_v16  ;;  %301 = vmatprep.mubr.bf16.mxu0 %v571_v18 }
  0x63   :  { %p537_p1 = por %p536_p0, %p535_p13 }
  0x65   :  { %272 = vmatpush1.bf16.msra.mxu0 %v411_v17  ;;  %p538_p2 = pnand %p537_p1, %p531_p12 }
 0x133   :  { %v153_v9 = vpop.f32.mrb[0].mxu0 }
 0x134   :  { %v154_v10 = vadd.f32 %v359_v8, %v153_v9  ;;  %v382_v11 = vpop.f32.mrb[1].mxu0 }
 0x135   :  { %v156_v12 = vpop.f32.mrb[2].mxu0 }
 0x136   :  { %v159_v13 = vmax.f32 %v154_v10, 0.0  ;;  %v383_v14 = vpop.f32.mrb[3].mxu0 }
 0x138   :  { %v160_v15 = vpack.c.bf16 %v159_v13, %v159_v13 }
 0x13a   :  { %389 = vmatmul.mubr.msk.bf16.vlgmr.msra.gmra.mrb[0].mxu1 %vm184_vm2, %v160_v15 }
 0x20d   :  { %v222_v20 = vpop.f32.mrb[0].mxu1 }
 0x20e   :  { %v223_v21 = vadd.f32 %v362_v19, %v222_v20  ;;  %v390_v22 = vpop.f32.mrb[1].mxu1 }
 0x20f   :  { %v225_v23 = vpop.f32.mrb[2].mxu1 }
 0x210   :  { %v228_v24 = vmax.f32 %v223_v21, 0.0  ;;  %v391_v25 = vpop.f32.mrb[3].mxu1 }
 0x212   :  { %v229_v26 = vpack.c.bf16 %v228_v24, %v228_v24 }
 0x214   :  { %370 = vmatmul.mubr.msk.bf16.vlgmr.msra.gmra.mrb[4].mxu0 %vm184_vm2, %v229_v26 }
 0x2e7   :  { %v303_v32 = vpop.f32.mrb[4].mxu0 }
 0x2e8   :  { %v305_v33 = vpop.f32.mrb[5].mxu0  ;;  %v304_v44 = vadd.f32 %v303_v32, %v239_v41 }
 0x2e9   :  { %v306_v34 = vadd.f32 %v305_v33, %v243_v31  ;;  %v307_v35 = vpop.f32.mrb[6].mxu0 }
 0x2ea   :  { %v308_v36 = vpop.f32.mrb[7].mxu0 }
 0x2eb   :  { %v310_v37 = vmax.f32 %v306_v34, -20.0 }
 0x2ed   :  { %v311_v38 = vmin.f32 %v310_v37, 2.0 }
 0x2ef   :  { %v313_v39 = vmul.f32 1.442695, %v311_v38  ;;  %v319_v56 = vsub.f32 %v318_v54, %v311_v38 }
 0x2f1   :  { %414 = vpow2.f32 %v313_v39 }
 0x2fb   :  { %v415_v42 = vpop.eup %414 }
 0x2fc   :  { %v315_v45 = vmul.f32 %v415_v42, %v312_v43 }
 0x2fe   :  { %v316_v46 = vadd.f32 %v315_v45, %v304_v44 }
 0x300   :  { %416 = vtanh.f32 %v316_v46 }
 0x30a   :  { %v417_v47 = vpop.eup %416 }
 0x30b   :  { %v322_v48 = vmul.f32 %v417_v47, %v417_v47 }
 0x30d   :  { %v323_v50 = vsub.f32 1.0, %v322_v48 }
 0x30f   :  { %v330_v51 = vmul.f32 %v371_v49, %v323_v50 }
 0x311   :  { %v331_v52 = vadd.f32 1.1920929e-07, %v330_v51 }
 0x313   :  { %418 = vlog2.f32 %v331_v52 }
 0x31d   :  { %v419_v55 = vpop.eup %418 }
 0x31e   :  { %v333_v57 = vmul.f32 0.6931472, %v419_v55 }
 0x320   :  { %v334_v58 = vsub.f32 %v319_v56, %v333_v57 }
 0x322   :  { %v336_v59 = vsel %vm335_vm3, %v334_v58, 0.0 }
 0x323   :  { %337 = vadd.xlane.f32.xlu0 %v336_v59 }
 0x3b0   :  { %v338_v60 = vpop.xlane.xlu0 %337 }
 0x3b1   :  { %v372_v61 = vadd.f32 -7.351508, %v338_v60 }
 0x3b3   :  { %v340_v62 = vsel %vm335_vm3, %v417_v47, %v372_v61 }
 0x3b4   :  { %341 = vst [vmem:[#allocation11] sm:$0xff] %v340_v62 }
 0x3b5   :  { %541 = shalt.err (!%p538_p2)
}
 0x3b6   :  { %s542_s14 = scalar_lea.hbm %s724_s9, 128 }
 0x3b7   :  { %p543_p3 = scmp.ne.s32.totalorder %s724_s9, %s542_s14  ;;  %p546_p4 = scmp.lt.u32.totalorder %s542_s14, %s724_s9 }
 0x3b9   :  { %p548_p5 = pnand %p546_p4, %p543_p3 }
 0x3bb   :  { %551 = shalt.err (!%p548_p5)
}
 0x3bc   :  { %351 = dma.vmem_to_hbm [thread:$0]  %s349_s11, 128, %s724_s9, [#allocation4]  }
 0x3bd   :  { %558 = dma.done.wait [#allocation4], 128  }
 0x3be   :  { %559 = vsyncadd [#allocation4], 4294967168 }
 0x3bf   :  { %355 = vsyncpa [#allocation3], 1 }
 0x3c0   :  { %356 = vsyncpa [#allocation6], 1 }
 0x3c1   :  { %357 = vsyncpa [#allocation9], 1 }
 0x3c2   :  { %358 = vsyncpa [#allocation4], 1 }

// kernel: tpu_custom_call.1
= control target key start
LH: loop header
LB: loop body
LE: loop exit
PB: predicated region body
PF: predicated region fallthrough
CT: control target
= control target key end

     0   :  { %14 = vsyncpa [#allocation3], 0  ;;  %s715_s0 = inlined_call_operand.hbm [shape: f32[8,16], index: 0, kind: input, shape index: {}]   ;;  %s716_s1 = inlined_call_operand.hbm [shape: f32[8,8], index: 1, kind: input, shape index: {}]   ;;  %s717_s2 = inlined_call_operand.hbm [shape: bf16[16,32], index: 2, kind: input, shape index: {}]   ;;  %s718_s3 = inlined_call_operand.vmem [shape: f32[1,32], index: 3, kind: input, shape index: {}]   ;;  %s719_s4 = inlined_call_operand.hbm [shape: bf16[32,32], index: 4, kind: input, shape index: {}]   ;;  %s720_s5 = inlined_call_operand.vmem [shape: f32[1,32], index: 5, kind: input, shape index: {}]   ;;  %s721_s6 = inlined_call_operand.hbm [shape: bf16[32,256], index: 6, kind: input, shape index: {}]   ;;  %s722_s7 = inlined_call_operand.vmem [shape: f32[1,256], index: 7, kind: input, shape index: {}]   ;;  %s723_s8 = inlined_call_operand.vmem [shape: f32[1,8], index: 8, kind: input, shape index: {}]   ;;  %s724_s9 = inlined_call_operand.hbm [shape: f32[8,128], index: 9, kind: output, shape index: {}]  }
   0x1   :  { %15 = vsyncpa [#allocation6], 0 }
   0x2   :  { %16 = vsyncpa [#allocation9], 0 }
   0x3   :  { %17 = vsyncpa [#allocation4], 0  ;;  %s560_s30 = smov [#allocation5]   ;;  %s420_s13 = scalar_lea.hbm %s716_s1, 128 }
   0x4   :  { %s34_s10 = sshll.u32 %s560_s30, 4  ;;  %p421_p0 = scmp.ne.s32.totalorder %s716_s1, %s420_s13  ;;  %s35_s10 = int_to_ptr.vmem [resolvable:$true] %s34_s10 }
   0x5   :  { %p424_p1 = scmp.lt.u32.totalorder %s420_s13, %s716_s1 }
   0x7   :  { %p426_p2 = pnand %p424_p1, %p421_p0 }
   0x9   :  { %429 = shalt.err (!%p426_p2)
}
   0xa   :  { %s430_s18 = scalar_lea.vmem %s35_s10, 128  ;;  %p435_p4 = scmp.lt.s32.totalorder %s35_s10, %s35_s10 }
   0xb   :  { %p431_p3 = scmp.ne.s32.totalorder %s35_s10, %s430_s18  ;;  %p436_p5 = scmp.lt.s32.totalorder %s430_s18, %s430_s18 }
   0xd   :  { %p437_p6 = por %p436_p5, %p435_p4 }
   0xf   :  { %p438_p7 = pnand %p437_p6, %p431_p3 }
  0x11   :  { %441 = shalt.err (!%p438_p7)
}
  0x12   :  { %37 = dma.hbm_to_vmem [thread:$0]  %s716_s1, 128, %s35_s10, [#allocation6]  }
  0x13   :  { %s561_s21 = smov [#allocation8]   ;;  %s562_s23 = smov [#allocation2]  }
  0x14   :  { %s57_s22 = sshll.u32 %s561_s21, 4  ;;  %s24_s24 = sshll.u32 %s562_s23, 4  ;;  %s58_s22 = int_to_ptr.vmem [resolvable:$true] %s57_s22  ;;  %s25_s24 = int_to_ptr.vmem [resolvable:$true] %s24_s24 }
  0x15   :  { %s442_s27 = scalar_lea.hbm %s719_s4, 256 }
  0x16   :  { %p443_p8 = scmp.ne.s32.totalorder %s719_s4, %s442_s27  ;;  %p446_p9 = scmp.lt.u32.totalorder %s442_s27, %s719_s4 }
  0x18   :  { %p448_p10 = pnand %p446_p9, %p443_p8 }
  0x1a   :  { %451 = shalt.err (!%p448_p10)
}
  0x1b   :  { %s452_s1 = scalar_lea.vmem %s58_s22, 256  ;;  %p457_p12 = scmp.lt.s32.totalorder %s58_s22, %s58_s22 }
  0x1c   :  { %p453_p11 = scmp.ne.s32.totalorder %s58_s22, %s452_s1  ;;  %p458_p13 = scmp.lt.s32.totalorder %s452_s1, %s452_s1 }
  0x1e   :  { %p459_p0 = por %p458_p13, %p457_p12 }
  0x20   :  { %p460_p1 = pnand %p459_p0, %p453_p11 }
  0x22   :  { %463 = shalt.err (!%p460_p1)
}
  0x23   :  { %s563_s10 = smov 64   ;;  %s564_s12 = smov 4  }
  0x24   :  { %63 = dma.hbm_to_vmem [thread:$0]  %s719_s4, 256, %s58_s22, [#allocation9], %s563_s10, %s563_s10, %s564_s12  }
  0x25   :  { %s464_s17 = scalar_lea.hbm %s715_s0, 128 }
  0x26   :  { %p465_p2 = scmp.ne.s32.totalorder %s715_s0, %s464_s17  ;;  %p468_p3 = scmp.lt.u32.totalorder %s464_s17, %s715_s0 }
  0x28   :  { %p470_p4 = pnand %p468_p3, %p465_p2 }
  0x2a   :  { %473 = shalt.err (!%p470_p4)
}
  0x2b   :  { %s474_s23 = scalar_lea.vmem %s25_s24, 128  ;;  %p479_p6 = scmp.lt.s32.totalorder %s25_s24, %s25_s24 }
  0x2c   :  { %p475_p5 = scmp.ne.s32.totalorder %s25_s24, %s474_s23  ;;  %p480_p7 = scmp.lt.s32.totalorder %s474_s23, %s474_s23 }
  0x2e   :  { %p481_p8 = por %p480_p7, %p479_p6 }
  0x30   :  { %p482_p9 = pnand %p481_p8, %p475_p5 }
  0x32   :  { %485 = shalt.err (!%p482_p9)
}
  0x33   :  { %27 = dma.hbm_to_vmem [thread:$0]  %s715_s0, 128, %s25_s24, [#allocation3]  }
  0x34   :  { %s565_s25 = smov [#allocation7]   ;;  %s566_s27 = smov [#allocation10]  }
  0x35   :  { %s43_s26 = sshll.u32 %s565_s25, 4  ;;  %s71_s28 = sshll.u32 %s566_s27, 4  ;;  %s44_s26 = int_to_ptr.vmem [resolvable:$true] %s43_s26  ;;  %s72_s28 = int_to_ptr.vmem [resolvable:$true] %s71_s28 }
  0x36   :  { %s486_s11 = scalar_lea.hbm %s717_s2, 128 }
  0x37   :  { %p487_p10 = scmp.ne.s32.totalorder %s717_s2, %s486_s11  ;;  %p490_p11 = scmp.lt.u32.totalorder %s486_s11, %s717_s2 }
  0x39   :  { %p492_p12 = pnand %p490_p11, %p487_p10 }
  0x3b   :  { %495 = shalt.err (!%p492_p12)
}
  0x3c   :  { %s496_s0 = scalar_lea.vmem %s44_s26, 128  ;;  %p501_p0 = scmp.lt.s32.totalorder %s44_s26, %s44_s26 }
  0x3d   :  { %p497_p13 = scmp.ne.s32.totalorder %s44_s26, %s496_s0  ;;  %p502_p1 = scmp.lt.s32.totalorder %s496_s0, %s496_s0 }
  0x3f   :  { %p503_p2 = por %p502_p1, %p501_p0 }
  0x41   :  { %p504_p3 = pnand %p503_p2, %p497_p13 }
  0x43   :  { %507 = shalt.err (!%p504_p3)
}
  0x44   :  { %49 = dma.hbm_to_vmem [thread:$0]  %s717_s2, 128, %s44_s26, [#allocation6], %s563_s10, %s563_s10, %s564_s12  }
  0x45   :  { %s508_s19 = scalar_lea.hbm %s721_s6, 512 }
  0x46   :  { %p509_p4 = scmp.ne.s32.totalorder %s721_s6, %s508_s19  ;;  %p512_p5 = scmp.lt.u32.totalorder %s508_s19, %s721_s6 }
  0x48   :  { %p514_p6 = pnand %p512_p5, %p509_p4 }
  0x4a   :  { %517 = shalt.err (!%p514_p6)
}
  0x4b   :  { %s518_s22 = scalar_lea.vmem %s72_s28, 512  ;;  %p523_p8 = scmp.lt.s32.totalorder %s72_s28, %s72_s28 }
  0x4c   :  { %p519_p7 = scmp.ne.s32.totalorder %s72_s28, %s518_s22  ;;  %p524_p9 = scmp.lt.s32.totalorder %s518_s22, %s518_s22 }
  0x4e   :  { %p525_p10 = por %p524_p9, %p523_p8 }
  0x50   :  { %p526_p11 = pnand %p525_p10, %p519_p7 }
  0x52   :  { %529 = shalt.err (!%p526_p11)
}
  0x53   :  { %s567_s2 = smov 128   ;;  %s568_s10 = smov 8  }
  0x54   :  { %77 = dma.hbm_to_vmem [thread:$0]  %s721_s6, 512, %s72_s28, [#allocation9], %s567_s2, %s567_s2, %s568_s10  }
  0x55   :  { %552 = dma.done.wait [#allocation3], 128  }
  0x56   :  { %553 = vsyncadd [#allocation3], 4294967168 }
  0x57   :  { %554 = dma.done.wait [#allocation6], 256  }
  0x58   :  { %555 = vsyncadd [#allocation6], 4294967040 }
  0x59   :  { %556 = dma.done.wait [#allocation9], 768  }
  0x5a   :  { %557 = vsyncadd [#allocation9], 4294966528  ;;  %v569_v0 = vmov 0.0   ;;  %vm570_vm0 = vmmov 0   ;;  %v405_v1 = vld [vmem:[#allocation7] sm:$0xff]   ;;  %v98_v2 = vld [vmem:[#allocation2] sm:$0xff]  ;;  %v236_v27 = vlaneseq }
  0x5b   :  { %378 = vmatprep.subr.bf16.mxu0 %v569_v0  ;;  %380 = vmatprep.mubr.msk.bf16.mxu0 %vm570_vm0, %v569_v0  ;;  %vm115_vm1 = vcmask 130048   ;;  %v99_v3 = vpack.c.bf16 %v98_v2, %v98_v2  ;;  %v406_v4 = vld [vmem:[#allocation8] sm:$0xff]   ;;  %v407_v5 = vld [vmem:[#allocation8 + $0x8] sm:$0xff]   ;;  %v408_v6 = vld [vmem:[#allocation10] ss:$8 sps:$4 sm:$0xff]   ;;  %vm184_vm2 = vcmask 261120  }
  0x5c   :  { %384 = vmatprep.subr.bf16.mxu1 %v569_v0  ;;  %388 = vmatprep.mubr.msk.bf16.mxu1 %vm570_vm0, %v569_v0  ;;  %v410_v7 = vld [vmem:[#allocation10 + $0x4] ss:$8 sps:$4 sm:$0xff]   ;;  %v359_v8 = vld [vmem:[%s718_s3] ss:$0 sm:$0xff]  ;;  %v413_v16 = vld [vmem:[#allocation10 + $0x14] ss:$8 sps:$4 sm:$0xff]  }
  0x5d   :  { %379 = vmatpush3.bf16.msra.mxu0 %v405_v1  ;;  %385 = vmatpush3.bf16.msra.mxu1 %v406_v4  ;;  %v411_v17 = vld [vmem:[#allocation10 + $0x10] ss:$8 sps:$4 sm:$0xff]   ;;  %v571_v18 = vmov 0   ;;  %v237_v28 = vshrl.u32 %v236_v27, 7  ;;  %v312_v43 = vld [vmem:[#allocation5] sm:$0xff]  ;;  %vm335_vm3 = vcmask 64512  }
  0x5e   :  { %386 = vmatprep.subr.bf16.mxu1 %v569_v0  ;;  %269 = vmatprep.subr.bf16.mxu0 %v410_v7  ;;  %v362_v19 = vld [vmem:[%s720_s5] ss:$0 sm:$0xff]  ;;  %v317_v53 = vmul.f32 -0.5, %v312_v43  ;;  %s572_s30 = smov [#allocation11]  }
  0x5f   :  { %v242_v29 = vsub.s32 1, %v237_v28  ;;  %v234_v30 = vld [vmem:[%s722_s7] sm:$0x3]  ;;  %v238_v40 = vsub.s32 0, %v237_v28  ;;  %s348_s11 = sshll.u32 %s572_s30, 4  ;;  %s349_s11 = int_to_ptr.vmem [resolvable:$true] %s348_s11 }
  0x60   :  { %381 = vmatmul.mubr.msk.bf16.vlgmr.msra.gmra.mrb[0].mxu0 %vm115_vm1, %v99_v3  ;;  %v371_v49 = vld [vmem:[%s723_s8] ss:$0 sm:$0xff]  ;;  %v318_v54 = vmul.f32 %v317_v53, %v312_v43  ;;  %s530_s8 = scalar_lea.vmem %s349_s11, 128  ;;  %p535_p13 = scmp.lt.s32.totalorder %s349_s11, %s349_s11 }
  0x61   :  { %387 = vmatpush3.bf16.msra.mxu1 %v407_v5  ;;  %270 = vmatpush1.bf16.msra.mxu0 %v408_v6  ;;  %v243_v31 = vrot.slane %v234_v30, %v242_v29  ;;  %v239_v41 = vrot.slane %v234_v30, %v238_v40  ;;  %p531_p12 = scmp.ne.s32.totalorder %s349_s11, %s530_s8  ;;  %p536_p0 = scmp.lt.s32.totalorder %s530_s8, %s530_s8 }
  0x62   :  { %271 = vmatprep.subr.bf16.mxu0 %v413_v16  ;;  %301 = vmatprep.mubr.bf16.mxu0 %v571_v18 }
  0x63   :  { %p537_p1 = por %p536_p0, %p535_p13 }
  0x65   :  { %272 = vmatpush1.bf16.msra.mxu0 %v411_v17  ;;  %p538_p2 = pnand %p537_p1, %p531_p12 }
 0x133   :  { %v153_v9 = vpop.f32.mrb[0].mxu0 }
 0x134   :  { %v154_v10 = vadd.f32 %v359_v8, %v153_v9  ;;  %v382_v11 = vpop.f32.mrb[1].mxu0 }
 0x135   :  { %v156_v12 = vpop.f32.mrb[2].mxu0 }
 0x136   :  { %v159_v13 = vmax.f32 %v154_v10, 0.0  ;;  %v383_v14 = vpop.f32.mrb[3].mxu0 }
 0x138   :  { %v160_v15 = vpack.c.bf16 %v159_v13, %v159_v13 }
 0x13a   :  { %389 = vmatmul.mubr.msk.bf16.vlgmr.msra.gmra.mrb[0].mxu1 %vm184_vm2, %v160_v15 }
 0x20d   :  { %v222_v20 = vpop.f32.mrb[0].mxu1 }
 0x20e   :  { %v223_v21 = vadd.f32 %v362_v19, %v222_v20  ;;  %v390_v22 = vpop.f32.mrb[1].mxu1 }
 0x20f   :  { %v225_v23 = vpop.f32.mrb[2].mxu1 }
 0x210   :  { %v228_v24 = vmax.f32 %v223_v21, 0.0  ;;  %v391_v25 = vpop.f32.mrb[3].mxu1 }
 0x212   :  { %v229_v26 = vpack.c.bf16 %v228_v24, %v228_v24 }
 0x214   :  { %370 = vmatmul.mubr.msk.bf16.vlgmr.msra.gmra.mrb[4].mxu0 %vm184_vm2, %v229_v26 }
 0x2e7   :  { %v303_v32 = vpop.f32.mrb[4].mxu0 }
 0x2e8   :  { %v305_v33 = vpop.f32.mrb[5].mxu0  ;;  %v304_v44 = vadd.f32 %v303_v32, %v239_v41 }
 0x2e9   :  { %v306_v34 = vadd.f32 %v305_v33, %v243_v31  ;;  %v307_v35 = vpop.f32.mrb[6].mxu0 }
 0x2ea   :  { %v308_v36 = vpop.f32.mrb[7].mxu0 }
 0x2eb   :  { %v310_v37 = vmax.f32 %v306_v34, -20.0 }
 0x2ed   :  { %v311_v38 = vmin.f32 %v310_v37, 2.0 }
 0x2ef   :  { %v313_v39 = vmul.f32 1.442695, %v311_v38  ;;  %v319_v56 = vsub.f32 %v318_v54, %v311_v38 }
 0x2f1   :  { %414 = vpow2.f32 %v313_v39 }
 0x2fb   :  { %v415_v42 = vpop.eup %414 }
 0x2fc   :  { %v315_v45 = vmul.f32 %v415_v42, %v312_v43 }
 0x2fe   :  { %v316_v46 = vadd.f32 %v315_v45, %v304_v44 }
 0x300   :  { %416 = vtanh.f32 %v316_v46 }
 0x30a   :  { %v417_v47 = vpop.eup %416 }
 0x30b   :  { %v322_v48 = vmul.f32 %v417_v47, %v417_v47 }
 0x30d   :  { %v323_v50 = vsub.f32 1.0, %v322_v48 }
 0x30f   :  { %v330_v51 = vmul.f32 %v371_v49, %v323_v50 }
 0x311   :  { %v331_v52 = vadd.f32 1.1920929e-07, %v330_v51 }
 0x313   :  { %418 = vlog2.f32 %v331_v52 }
 0x31d   :  { %v419_v55 = vpop.eup %418 }
 0x31e   :  { %v333_v57 = vmul.f32 0.6931472, %v419_v55 }
 0x320   :  { %v334_v58 = vsub.f32 %v319_v56, %v333_v57 }
 0x322   :  { %v336_v59 = vsel %vm335_vm3, %v334_v58, 0.0 }
 0x323   :  { %337 = vadd.xlane.f32.xlu0 %v336_v59 }
 0x3b0   :  { %v338_v60 = vpop.xlane.xlu0 %337 }
 0x3b1   :  { %v372_v61 = vadd.f32 -7.351508, %v338_v60 }
 0x3b3   :  { %v340_v62 = vsel %vm335_vm3, %v417_v47, %v372_v61 }
 0x3b4   :  { %341 = vst [vmem:[#allocation11] sm:$0xff] %v340_v62 }
 0x3b5   :  { %541 = shalt.err (!%p538_p2)
}
 0x3b6   :  { %s542_s14 = scalar_lea.hbm %s724_s9, 128 }
 0x3b7   :  { %p543_p3 = scmp.ne.s32.totalorder %s724_s9, %s542_s14  ;;  %p546_p4 = scmp.lt.u32.totalorder %s542_s14, %s724_s9 }
 0x3b9   :  { %p548_p5 = pnand %p546_p4, %p543_p3 }
 0x3bb   :  { %551 = shalt.err (!%p548_p5)
}
 0x3bc   :  { %351 = dma.vmem_to_hbm [thread:$0]  %s349_s11, 128, %s724_s9, [#allocation4]  }
 0x3bd   :  { %558 = dma.done.wait [#allocation4], 128  }
 0x3be   :  { %559 = vsyncadd [#allocation4], 4294967168 }
 0x3bf   :  { %355 = vsyncpa [#allocation3], 1 }
 0x3c0   :  { %356 = vsyncpa [#allocation6], 1 }
 0x3c1   :  { %357 = vsyncpa [#allocation9], 1 }
 0x3c2   :  { %358 = vsyncpa [#allocation4], 1 }

</bundles_post_ra>
